<compile_context>
chip_gen: v7x
topology: tpu7x:2x2x1
jax: 0.10.0
libtpu: 0.0.40
codegen_flags: <defaults>
</compile_context>

<pallas_src>
import jax
import jax.numpy as jnp
from jax.experimental import pallas as pl
from jax.experimental.pallas import tpu as pltpu


def convfuser_kernel(x_lo_ref, x_hi_ref, w_ref, shift_ref, o_ref, slab_ref):
    # x_lo_ref:  (1, TH, W+2, Cp)  bf16  padded body rows   [t*TH, t*TH+TH)
    # x_hi_ref:  (1, 2,  W+2, Cp)  bf16  padded halo rows    [t*TH+TH, t*TH+TH+2)
    # w_ref:     (9*Cp, Coutp)     bf16  tap-major rows (ky*3+kx)*Cp + c, BN-scale folded
    # shift_ref: (1, Coutp)        f32   folded BN shift = beta - mean * scale
    # o_ref:     (1, TH, W, Coutp) f32
    # slab_ref:  (TH*W, 3*Cp)      bf16  persistent im2col scratch for one ky row of taps
    TH = o_ref.shape[1]
    W = o_ref.shape[2]
    Coutp = o_ref.shape[3]
    Cp = x_lo_ref.shape[3]

    # Stitch the 2 halo rows below the body rows once (major-axis concat, cheap).
    x = jnp.concatenate([x_lo_ref[0], x_hi_ref[0]], axis=0)          # (TH+2, W+2, Cp)

    acc = jnp.zeros((TH * W, Coutp), jnp.float32)
    for ky in range(3):
        # Fill the ky-slab: 3 taps, each written at a 128-aligned lane offset (unmasked).
        for kx in range(3):
            slab_ref[:, kx * Cp:(kx + 1) * Cp] = (
                x[ky:ky + TH, kx:kx + W, :].reshape(TH * W, Cp))
        # One accumulating MXU matmul per ky (K = 3*Cp), f32 accumulation.
        acc = acc + jnp.dot(
            slab_ref[...],
            w_ref[ky * 3 * Cp:(ky + 1) * 3 * Cp, :],
            preferred_element_type=jnp.float32)

    # BN scale is folded into w; epilogue is shift + ReLU only (f32), lane-dense store.
    y = jnp.maximum(acc + shift_ref[...], 0.0)
    o_ref[0] = y.reshape(TH, W, Coutp).astype(o_ref.dtype)


def _round_up(x, m):
    return (x + m - 1) // m * m


def _vmem_plan():
    """Generation-aware scoped-VMEM limit and tiling budget."""
    cap = 64 << 20                      # conservative default (v7x per-core VMEM)
    try:
        info = pltpu.get_tpu_info()
        cap = int(getattr(info, "vmem_capacity_bytes", cap)) or cap
    except Exception:
        pass
    if cap <= (64 << 20):               # v7x: 64 MiB physical -> leave headroom
        limit = 40 << 20
    else:                               # v5e / v6e: 128 MiB physical
        limit = 64 << 20
    budget = int(limit * 0.75)          # tiling budget leaves room for Mosaic scratch
    return limit, budget


def _vmem_use(th, W, Cp, Coutp):
    """Estimated in-kernel VMEM working set for a row tile of height `th`."""
    bf16, f32 = 2, 4
    wp = W + 2
    body = 2 * th * wp * Cp * bf16            # double-buffered body input block
    halo = 2 * 2 * wp * Cp * bf16             # double-buffered halo input block
    outb = 2 * th * W * Coutp * f32           # double-buffered output block
    wgt = 2 * 9 * Cp * Coutp * bf16           # (double-buffered) folded weight
    stitch = (th + 2) * wp * Cp * bf16        # stitched body+halo copy
    slab = th * W * 3 * Cp * bf16             # persistent im2col scratch
    acc = 2 * th * W * Coutp * f32            # f32 accumulator + epilogue temp
    tmp = 2 * th * W * Cp * bf16              # live im2col piece temporaries
    return body + halo + outb + wgt + stitch + slab + acc + tmp


def _pick_tile_rows(B, H, W, Cp, Coutp, budget):
    """Largest even row-tile TH dividing H that fits the VMEM budget, preferring
    enough grid steps (B*T >= 8, then >= 4, then >= 2) for megacore + pipelining."""
    assert H % 2 == 0, "ConvFuser Pallas kernel expects an even BEV height"
    divs = [d for d in range(2, H + 1) if H % d == 0 and d % 2 == 0]
    fitting = [d for d in divs if _vmem_use(d, W, Cp, Coutp) <= budget]
    if not fitting:
        fitting = [divs[0]]     # smallest tile; Mosaic will report if even this overflows
    for min_steps in (8, 4, 2):
        cands = [d for d in fitting if B * (H // d) >= min_steps]
        if cands:
            return max(cands)
    return max(fitting)


def conv_fuser(img_bev, lidar_bev, conv_w, bn_gamma, bn_beta, bn_mean, bn_var,
               eps=1e-5, compute_dtype=jnp.bfloat16, out_dtype=jnp.float32):
    """
    img_bev:   (B, C_img,   H, W) f32 NCHW
    lidar_bev: (B, C_lidar, H, W) f32 NCHW
    conv_w:    (Cout, Cin, 3, 3)  PyTorch OIHW conv weight, Cin = C_img + C_lidar
    returns:   (B, Cout, H, W) out_dtype NCHW == ReLU(BN(Conv(cat([img, lidar], dim=1))))
    Note: on v5e, passing out_dtype=jnp.bfloat16 halves vector-store / writeback pressure
    if the downstream backbone tolerates it.
    """
    B, Ci, H, W = img_bev.shape
    Cl = lidar_bev.shape[1]
    Cin = Ci + Cl
    Cout = conv_w.shape[0]

    Cp = _round_up(Cin, 128)        # lane-aligned input channels
    Coutp = _round_up(Cout, 128)    # lane-aligned output channels
    Wp = W + 2

    vmem_limit, vmem_budget = _vmem_plan()
    TH = _pick_tile_rows(B, H, W, Cp, Coutp, vmem_budget)
    T = H // TH

    # Channel concat + NCHW->NHWC + bf16 cast + spatial/channel zero-pad: one chained
    # expression so XLA emits a single fused relayout pass (one HBM read of each input,
    # one HBM write of the padded NHWC operand).
    x_p = jnp.pad(
        jnp.transpose(jnp.concatenate([img_bev, lidar_bev], axis=1),
                      (0, 2, 3, 1)).astype(compute_dtype),
        ((0, 0), (1, 1), (1, 1), (0, Cp - Cin)))              # (B, H+2, W+2, Cp)

    # Fold BN scale into the conv weight (in f32, before the bf16 cast); pad Cin rows
    # and Cout columns with zeros so padded channels contribute nothing.
    inv_std = bn_gamma / jnp.sqrt(bn_var + eps)               # (Cout,)
    w = jnp.transpose(conv_w, (2, 3, 1, 0))                   # (3, 3, Cin, Cout) f32
    w = w * inv_std[None, None, None, :]
    w = jnp.pad(w, ((0, 0), (0, 0), (0, Cp - Cin), (0, Coutp - Cout)))
    w_flat = w.reshape(9 * Cp, Coutp).astype(compute_dtype)   # tap-major rows

    shift = (bn_beta - bn_mean * inv_std)
    shift_p = jnp.pad(shift, (0, Coutp - Cout)).reshape(1, Coutp).astype(jnp.float32)

    # Body block: TH padded rows starting at element offset t*TH  (block row size = TH).
    body_spec = pl.BlockSpec((1, TH, Wp, Cp), lambda b, t: (b, t, 0, 0))
    # Halo block: 2 padded rows starting at element offset t*TH + TH.  Block row size is
    # 2, so block index = (t*TH + TH) // 2 = (t + 1) * (TH // 2); requires TH even.
    assert TH % 2 == 0
    halo_spec = pl.BlockSpec((1, 2, Wp, Cp), lambda b, t: (b, (t + 1) * (TH // 2), 0, 0))

    cost = pl.CostEstimate(
        flops=2 * B * H * W * 9 * Cp * Coutp,
        transcendentals=0,
        bytes_accessed=int(x_p.size * 2 + w_flat.size * 2
                           + B * H * W * Coutp * jnp.dtype(out_dtype).itemsize))

    out_nhwc = pl.pallas_call(
        convfuser_kernel,
        out_shape=jax.ShapeDtypeStruct((B, H, W, Coutp), out_dtype),
        grid_spec=pltpu.PrefetchScalarGridSpec(
            num_scalar_prefetch=0,
            grid=(B, T),
            in_specs=[
                body_spec,
                halo_spec,
                pl.BlockSpec((9 * Cp, Coutp), lambda b, t: (0, 0)),
                pl.BlockSpec((1, Coutp), lambda b, t: (0, 0)),
            ],
            out_specs=pl.BlockSpec((1, TH, W, Coutp), lambda b, t: (b, t, 0, 0)),
            scratch_shapes=[pltpu.VMEM((TH * W, 3 * Cp), compute_dtype)],
        ),
        compiler_params=pltpu.CompilerParams(
            dimension_semantics=("parallel", "parallel"),
            vmem_limit_bytes=vmem_limit),
        cost_estimate=cost,
    )(x_p, x_p, w_flat, shift_p)

    # Crop the lane padding and restore the PyTorch NCHW output convention.
    return jnp.transpose(out_nhwc[..., :Cout], (0, 3, 1, 2))


def _reference(img_bev, lidar_bev, conv_w, bn_gamma, bn_beta, bn_mean, bn_var, eps=1e-5):
    cat = jnp.concatenate([img_bev, lidar_bev], axis=1)
    y = jax.lax.conv_general_dilated(
        cat, conv_w, window_strides=(1, 1), padding=((1, 1), (1, 1)),
        dimension_numbers=("NCHW", "OIHW", "NCHW"))
    inv = bn_gamma / jnp.sqrt(bn_var + eps)
    y = (y - bn_mean[None, :, None, None]) * inv[None, :, None, None] + bn_beta[None, :, None, None]
    return jnp.maximum(y, 0.0)


if __name__ == "__main__":
    key = jax.random.PRNGKey(0)
    k1, k2, k3, k4, k5, k6, k7 = jax.random.split(key, 7)

    B, H, W = 2, 16, 16
    C_img, C_lidar = 4, 4          # IN_CHANNEL = C_img + C_lidar = 8
    Cout = 16                      # OUT_CHANNEL

    img_bev = jax.random.normal(k1, (B, C_img, H, W), jnp.float32)
    lidar_bev = jax.random.normal(k2, (B, C_lidar, H, W), jnp.float32)

    # Deterministic synthetic parameters (conv has bias=False per the module).
    conv_w = jax.random.normal(k3, (Cout, C_img + C_lidar, 3, 3), jnp.float32) * 0.1
    bn_gamma = 1.0 + 0.1 * jax.random.normal(k4, (Cout,), jnp.float32)
    bn_beta = 0.1 * jax.random.normal(k5, (Cout,), jnp.float32)
    bn_mean = 0.1 * jax.random.normal(k6, (Cout,), jnp.float32)
    bn_var = jnp.abs(jax.random.normal(k7, (Cout,), jnp.float32)) + 0.5

    out = conv_fuser(img_bev, lidar_bev, conv_w, bn_gamma, bn_beta, bn_mean, bn_var)
    out = jax.block_until_ready(out)

    ref = _reference(img_bev, lidar_bev, conv_w, bn_gamma, bn_beta, bn_mean, bn_var)
    assert out.shape == (B, Cout, H, W)
    # bf16 matmul operands (f32 accumulation) -> relaxed tolerance vs the f32 reference.
    assert jnp.allclose(out, ref, atol=5e-2, rtol=5e-2), float(jnp.max(jnp.abs(out - ref)))

    print("KERNEL_OK")
</pallas_src>

<mosaic_0001>
module attributes {stable_mosaic.version = 11 : i64} {
  func.func @convfuser_kernel(%arg0: i32, %arg1: i32, %arg2: memref<1x4x18x128xbf16, #tpu.memory_space<vmem>>, %arg3: memref<1x2x18x128xbf16, #tpu.memory_space<vmem>>, %arg4: memref<1152x128xbf16, #tpu.memory_space<vmem>>, %arg5: memref<1x128xf32, #tpu.memory_space<vmem>>, %arg6: memref<1x4x16x128xf32, #tpu.memory_space<vmem>>, %arg7: memref<64x384xbf16, #tpu.memory_space<vmem>>) attributes {dimension_semantics = [#tpu.dimension_semantics<parallel>, #tpu.dimension_semantics<parallel>], iteration_bounds = array<i64: 2, 4>, scalar_prefetch = 0 : i64, scratch_operands = 1 : i64, tpu.core_type = #tpu.core_type<tc>, window_params = [{transform_indices = @transform_0, window_bounds = array<i64: 1, 4, 18, 128>}, {transform_indices = @transform_1, window_bounds = array<i64: 1, 2, 18, 128>}, {pipeline_mode = #tpu.pipeline_mode<synchronous>, transform_indices = @transform_2, window_bounds = array<i64: 1152, 128>}, {pipeline_mode = #tpu.pipeline_mode<synchronous>, transform_indices = @transform_3, window_bounds = array<i64: 1, 128>}, {transform_indices = @transform_4, window_bounds = array<i64: 1, 4, 16, 128>}]} {
    %c0 = arith.constant 0 : index
    %c0_0 = arith.constant 0 : index
    %c0_1 = arith.constant 0 : index
    %c0_2 = arith.constant 0 : index
    %0 = vector.load %arg2[%c0, %c0_0, %c0_1, %c0_2] : memref<1x4x18x128xbf16, #tpu.memory_space<vmem>>, vector<1x4x18x128xbf16>
    %1 = vector.shape_cast %0 : vector<1x4x18x128xbf16> to vector<4x18x128xbf16>
    %c0_3 = arith.constant 0 : index
    %c0_4 = arith.constant 0 : index
    %c0_5 = arith.constant 0 : index
    %c0_6 = arith.constant 0 : index
    %2 = vector.load %arg3[%c0_3, %c0_4, %c0_5, %c0_6] : memref<1x2x18x128xbf16, #tpu.memory_space<vmem>>, vector<1x2x18x128xbf16>
    %3 = vector.shape_cast %2 : vector<1x2x18x128xbf16> to vector<2x18x128xbf16>
    %4 = tpu.concatenate %1, %3 in 0 : vector<4x18x128xbf16>, vector<2x18x128xbf16> -> vector<6x18x128xbf16>
    %cst = arith.constant 0.000000e+00 : f32
    %5 = vector.broadcast %cst : f32 to vector<64x128xf32>
    %6 = vector.extract_strided_slice %4 {offsets = [0, 0, 0], sizes = [4, 16, 128], strides = [1, 1, 1]} : vector<6x18x128xbf16> to vector<4x16x128xbf16>
    %7 = vector.shape_cast %6 : vector<4x16x128xbf16> to vector<64x128xbf16>
    %c0_7 = arith.constant 0 : index
    %c0_8 = arith.constant 0 : index
    %8 = vector.load %arg7[%c0_7, %c0_8] : memref<64x384xbf16, #tpu.memory_space<vmem>>, vector<64x128xbf16>
    tpu.vector_store %arg7[%c0_7, %c0_8], %7 {strides = array<i32>} : memref<64x384xbf16, #tpu.memory_space<vmem>>, vector<64x128xbf16>,
    %9 = vector.extract_strided_slice %4 {offsets = [0, 1, 0], sizes = [4, 16, 128], strides = [1, 1, 1]} : vector<6x18x128xbf16> to vector<4x16x128xbf16>
    %10 = vector.shape_cast %9 : vector<4x16x128xbf16> to vector<64x128xbf16>
    %c0_9 = arith.constant 0 : index
    %c128 = arith.constant 128 : index
    %11 = vector.load %arg7[%c0_9, %c128] : memref<64x384xbf16, #tpu.memory_space<vmem>>, vector<64x128xbf16>
    tpu.vector_store %arg7[%c0_9, %c128], %10 {strides = array<i32>} : memref<64x384xbf16, #tpu.memory_space<vmem>>, vector<64x128xbf16>,
    %12 = vector.extract_strided_slice %4 {offsets = [0, 2, 0], sizes = [4, 16, 128], strides = [1, 1, 1]} : vector<6x18x128xbf16> to vector<4x16x128xbf16>
    %13 = vector.shape_cast %12 : vector<4x16x128xbf16> to vector<64x128xbf16>
    %c0_10 = arith.constant 0 : index
    %c256 = arith.constant 256 : index
    %14 = vector.load %arg7[%c0_10, %c256] : memref<64x384xbf16, #tpu.memory_space<vmem>>, vector<64x128xbf16>
    tpu.vector_store %arg7[%c0_10, %c256], %13 {strides = array<i32>} : memref<64x384xbf16, #tpu.memory_space<vmem>>, vector<64x128xbf16>,
    %c0_11 = arith.constant 0 : index
    %c0_12 = arith.constant 0 : index
    %15 = vector.load %arg7[%c0_11, %c0_12] : memref<64x384xbf16, #tpu.memory_space<vmem>>, vector<64x384xbf16>
    %c0_13 = arith.constant 0 : index
    %c0_14 = arith.constant 0 : index
    %16 = vector.load %arg4[%c0_13, %c0_14] : memref<1152x128xbf16, #tpu.memory_space<vmem>>, vector<384x128xbf16>
    %cst_15 = arith.constant dense<0.000000e+00> : vector<64x128xf32>
    %17 = tpu.matmul %15, %16, %cst_15 {dimension_numbers = #tpu.dot_dimension_numbers<[1], [0], [0], [1], [0, 0, 1, 1], [], []>} : vector<64x384xbf16>, vector<384x128xbf16>, vector<64x128xf32> -> vector<64x128xf32>
    %18 = arith.addf %5, %17 : vector<64x128xf32>
    %19 = vector.extract_strided_slice %4 {offsets = [1, 0, 0], sizes = [4, 16, 128], strides = [1, 1, 1]} : vector<6x18x128xbf16> to vector<4x16x128xbf16>
    %20 = vector.shape_cast %19 : vector<4x16x128xbf16> to vector<64x128xbf16>
    %c0_16 = arith.constant 0 : index
    %c0_17 = arith.constant 0 : index
    %21 = vector.load %arg7[%c0_16, %c0_17] : memref<64x384xbf16, #tpu.memory_space<vmem>>, vector<64x128xbf16>
    tpu.vector_store %arg7[%c0_16, %c0_17], %20 {strides = array<i32>} : memref<64x384xbf16, #tpu.memory_space<vmem>>, vector<64x128xbf16>,
    %22 = vector.extract_strided_slice %4 {offsets = [1, 1, 0], sizes = [4, 16, 128], strides = [1, 1, 1]} : vector<6x18x128xbf16> to vector<4x16x128xbf16>
    %23 = vector.shape_cast %22 : vector<4x16x128xbf16> to vector<64x128xbf16>
    %c0_18 = arith.constant 0 : index
    %c128_19 = arith.constant 128 : index
    %24 = vector.load %arg7[%c0_18, %c128_19] : memref<64x384xbf16, #tpu.memory_space<vmem>>, vector<64x128xbf16>
    tpu.vector_store %arg7[%c0_18, %c128_19], %23 {strides = array<i32>} : memref<64x384xbf16, #tpu.memory_space<vmem>>, vector<64x128xbf16>,
    %25 = vector.extract_strided_slice %4 {offsets = [1, 2, 0], sizes = [4, 16, 128], strides = [1, 1, 1]} : vector<6x18x128xbf16> to vector<4x16x128xbf16>
    %26 = vector.shape_cast %25 : vector<4x16x128xbf16> to vector<64x128xbf16>
    %c0_20 = arith.constant 0 : index
    %c256_21 = arith.constant 256 : index
    %27 = vector.load %arg7[%c0_20, %c256_21] : memref<64x384xbf16, #tpu.memory_space<vmem>>, vector<64x128xbf16>
    tpu.vector_store %arg7[%c0_20, %c256_21], %26 {strides = array<i32>} : memref<64x384xbf16, #tpu.memory_space<vmem>>, vector<64x128xbf16>,
    %c0_22 = arith.constant 0 : index
    %c0_23 = arith.constant 0 : index
    %28 = vector.load %arg7[%c0_22, %c0_23] : memref<64x384xbf16, #tpu.memory_space<vmem>>, vector<64x384xbf16>
    %c384 = arith.constant 384 : index
    %c0_24 = arith.constant 0 : index
    %29 = vector.load %arg4[%c384, %c0_24] : memref<1152x128xbf16, #tpu.memory_space<vmem>>, vector<384x128xbf16>
    %cst_25 = arith.constant dense<0.000000e+00> : vector<64x128xf32>
    %30 = tpu.matmul %28, %29, %cst_25 {dimension_numbers = #tpu.dot_dimension_numbers<[1], [0], [0], [1], [0, 0, 1, 1], [], []>} : vector<64x384xbf16>, vector<384x128xbf16>, vector<64x128xf32> -> vector<64x128xf32>
    %31 = arith.addf %18, %30 : vector<64x128xf32>
    %32 = vector.extract_strided_slice %4 {offsets = [2, 0, 0], sizes = [4, 16, 128], strides = [1, 1, 1]} : vector<6x18x128xbf16> to vector<4x16x128xbf16>
    %33 = vector.shape_cast %32 : vector<4x16x128xbf16> to vector<64x128xbf16>
    %c0_26 = arith.constant 0 : index
    %c0_27 = arith.constant 0 : index
    %34 = vector.load %arg7[%c0_26, %c0_27] : memref<64x384xbf16, #tpu.memory_space<vmem>>, vector<64x128xbf16>
    tpu.vector_store %arg7[%c0_26, %c0_27], %33 {strides = array<i32>} : memref<64x384xbf16, #tpu.memory_space<vmem>>, vector<64x128xbf16>,
    %35 = vector.extract_strided_slice %4 {offsets = [2, 1, 0], sizes = [4, 16, 128], strides = [1, 1, 1]} : vector<6x18x128xbf16> to vector<4x16x128xbf16>
    %36 = vector.shape_cast %35 : vector<4x16x128xbf16> to vector<64x128xbf16>
    %c0_28 = arith.constant 0 : index
    %c128_29 = arith.constant 128 : index
    %37 = vector.load %arg7[%c0_28, %c128_29] : memref<64x384xbf16, #tpu.memory_space<vmem>>, vector<64x128xbf16>
    tpu.vector_store %arg7[%c0_28, %c128_29], %36 {strides = array<i32>} : memref<64x384xbf16, #tpu.memory_space<vmem>>, vector<64x128xbf16>,
    %38 = vector.extract_strided_slice %4 {offsets = [2, 2, 0], sizes = [4, 16, 128], strides = [1, 1, 1]} : vector<6x18x128xbf16> to vector<4x16x128xbf16>
    %39 = vector.shape_cast %38 : vector<4x16x128xbf16> to vector<64x128xbf16>
    %c0_30 = arith.constant 0 : index
    %c256_31 = arith.constant 256 : index
    %40 = vector.load %arg7[%c0_30, %c256_31] : memref<64x384xbf16, #tpu.memory_space<vmem>>, vector<64x128xbf16>
    tpu.vector_store %arg7[%c0_30, %c256_31], %39 {strides = array<i32>} : memref<64x384xbf16, #tpu.memory_space<vmem>>, vector<64x128xbf16>,
    %c0_32 = arith.constant 0 : index
    %c0_33 = arith.constant 0 : index
    %41 = vector.load %arg7[%c0_32, %c0_33] : memref<64x384xbf16, #tpu.memory_space<vmem>>, vector<64x384xbf16>
    %c768 = arith.constant 768 : index
    %c0_34 = arith.constant 0 : index
    %42 = vector.load %arg4[%c768, %c0_34] : memref<1152x128xbf16, #tpu.memory_space<vmem>>, vector<384x128xbf16>
    %cst_35 = arith.constant dense<0.000000e+00> : vector<64x128xf32>
    %43 = tpu.matmul %41, %42, %cst_35 {dimension_numbers = #tpu.dot_dimension_numbers<[1], [0], [0], [1], [0, 0, 1, 1], [], []>} : vector<64x384xbf16>, vector<384x128xbf16>, vector<64x128xf32> -> vector<64x128xf32>
    %44 = arith.addf %31, %43 : vector<64x128xf32>
    %c0_36 = arith.constant 0 : index
    %c0_37 = arith.constant 0 : index
    %45 = vector.load %arg5[%c0_36, %c0_37] : memref<1x128xf32, #tpu.memory_space<vmem>>, vector<1x128xf32>
    %46 = vector.broadcast %45 : vector<1x128xf32> to vector<64x128xf32>
    %47 = arith.addf %44, %46 : vector<64x128xf32>
    %cst_38 = arith.constant 0.000000e+00 : f32
    %48 = vector.broadcast %cst_38 : f32 to vector<64x128xf32>
    %49 = arith.maximumf %47, %48 : vector<64x128xf32>
    %50 = vector.shape_cast %49 : vector<64x128xf32> to vector<4x16x128xf32>
    %c0_39 = arith.constant 0 : index
    %c0_40 = arith.constant 0 : index
    %c0_41 = arith.constant 0 : index
    %c0_42 = arith.constant 0 : index
    %51 = vector.load %arg6[%c0_39, %c0_40, %c0_41, %c0_42] : memref<1x4x16x128xf32, #tpu.memory_space<vmem>>, vector<1x4x16x128xf32>
    %52 = vector.shape_cast %51 : vector<1x4x16x128xf32> to vector<4x16x128xf32>
    %53 = vector.shape_cast %50 : vector<4x16x128xf32> to vector<1x4x16x128xf32>
    tpu.vector_store %arg6[%c0_39, %c0_40, %c0_41, %c0_42], %53 {strides = array<i32>} : memref<1x4x16x128xf32, #tpu.memory_space<vmem>>, vector<1x4x16x128xf32>,
    return
  }
  func.func @transform_0(%arg0: i32, %arg1: i32) -> (i32, i32, i32, i32) {
    %c0_i32 = arith.constant 0 : i32
    %c0_i32_0 = arith.constant 0 : i32
    %c0_i32_1 = arith.constant 0 : i32
    return %arg0, %arg1, %c0_i32, %c0_i32_0 : i32, i32, i32, i32
  }
  func.func @transform_1(%arg0: i32, %arg1: i32) -> (i32, i32, i32, i32) {
    %c1_i32 = arith.constant 1 : i32
    %0 = arith.addi %arg1, %c1_i32 : i32
    %c2_i32 = arith.constant 2 : i32
    %1 = arith.muli %0, %c2_i32 : i32
    %c0_i32 = arith.constant 0 : i32
    %c0_i32_0 = arith.constant 0 : i32
    %c0_i32_1 = arith.constant 0 : i32
    return %arg0, %1, %c0_i32, %c0_i32_0 : i32, i32, i32, i32
  }
  func.func @transform_2(%arg0: i32, %arg1: i32) -> (i32, i32) {
    %c0_i32 = arith.constant 0 : i32
    %c0_i32_0 = arith.constant 0 : i32
    %c0_i32_1 = arith.constant 0 : i32
    return %c0_i32, %c0_i32_0 : i32, i32
  }
  func.func @transform_3(%arg0: i32, %arg1: i32) -> (i32, i32) {
    %c0_i32 = arith.constant 0 : i32
    %c0_i32_0 = arith.constant 0 : i32
    %c0_i32_1 = arith.constant 0 : i32
    return %c0_i32, %c0_i32_0 : i32, i32
  }
  func.func @transform_4(%arg0: i32, %arg1: i32) -> (i32, i32, i32, i32) {
    %c0_i32 = arith.constant 0 : i32
    %c0_i32_0 = arith.constant 0 : i32
    %c0_i32_1 = arith.constant 0 : i32
    return %arg0, %arg1, %c0_i32, %c0_i32_0 : i32, i32, i32, i32
  }
}

</mosaic_0001>

<bundles_post_ra>
// kernel: tpu_custom_call.1
= control target key start
LH: loop header
LB: loop body
LE: loop exit
PB: predicated region body
PF: predicated region fallthrough
CT: control target
= control target key end

     0   :  { %9 = vsyncpa [#allocation4], 0  ;;  %s3060_s0 = inlined_call_operand.vmem [shape: bf16[2,18,18,128], index: 0, kind: input, shape index: {}]   ;;  %s3061_s1 = inlined_call_operand.vmem [shape: bf16[2,18,18,128], index: 1, kind: input, shape index: {}]   ;;  %s3062_s2 = inlined_call_operand.vmem [shape: bf16[1152,128], index: 2, kind: input, shape index: {}]   ;;  %s3063_s3 = inlined_call_operand.vmem [shape: f32[1,128], index: 3, kind: input, shape index: {}]   ;;  %s3064_s4 = inlined_call_operand.hbm [shape: f32[2,16,16,128], index: 4, kind: output, shape index: {}]  }
   0x1   :  { %11 = vsyncpa [#allocation4 + $0x1], 0  ;;  %s2482_s15 = smov 0   ;;  %s2484_s16 = smov 0  }
   0x2   :  { %s2486_s17 = smov 0   ;;  %s2488_s18 = smov 0  }
   0x3   :  { %s2490_s19 = smov 0   ;;  %s2492_s20 = smov 0  }
   0x4   :  { %s2494_s21 = smov 0   ;;  %s2496_s22 = smov 0  }
   0x5 LB: > { %s1809_s23 = sadd.s32 4294967295, %s2452_s22   ;;  %s1810_s24 = sadd.s32 4294967294, %s2452_s22   ;;  %s2452_s22 = sphi %s2496_s22, %s17_s22   ;;  %s2448_s21 = sphi %s2494_s21, %s3083_s21   ;;  %s2444_s20 = sphi %s2492_s20, %s3082_s20   ;;  %s2440_s19 = sphi %s2490_s19, %s3081_s19   ;;  %s2436_s18 = sphi %s2488_s18, %s3080_s18   ;;  %s2432_s17 = sphi %s2486_s17, %s3079_s17   ;;  %s2428_s16 = sphi %s2484_s16, %s3078_s16   ;;  %s2424_s15 = sphi %s2482_s15, %s3077_s15  }
   0x6   : > { %s26_s25 = sadd.s32 1, %s2444_s20  ;;  %s29_s26 = sadd.s32 1, %s2448_s21 }
   0x7   : > { %p27_p0 = scmp.ge.s32.totalorder %s26_s25, 4  ;;  %p150_p1 = scmp.ne.s32.totalorder %s2432_s17, %s2428_s16 }
   0x8   : > { %p151_p2 = scmp.eq.s32.totalorder %s1809_s23, 7  ;;  %p156_p5 = scmp.ne.s32.totalorder %s2428_s16, %s2424_s15 }
   0x9   : > { %s3085_s25 = smov (%p27_p0, %s26_s25), 0  ;;  %s3087_s26 = smov (!%p27_p0, %s29_s26), %s2448_s21 }
   0xa   : > { %3067 = sst [smem:[#allocation6_spill]] %s3085_s25  ;;  %s136_s27 = ssub.s32 %s2444_s20, %s3085_s25 }
   0xb   : > { %p2533_p3 = por %p151_p2, %p150_p1  ;;  %p31_p4 = scmp.ge.s32.totalorder %s3087_s26, 2 }
   0xc   : > { %p157_p6 = scmp.eq.s32.totalorder %s1810_s24, 7  ;;  %p1815_p7 = scmp.ge.s32.totalorder %s2452_s22, 1 }
   0xd   : > { %s3089_s26 = smov (%p31_p4, %s3087_s26), 0  ;;  %p223_p9 = scmp.lt.s32.totalorder %s2452_s22, 9 }
   0xe   : > { %3069 = sst [smem:[#allocation7_spill]] %s3089_s26  ;;  %p2542_p8 = por %p157_p6, %p156_p5 }
   0xf   : > { %s135_s30 = ssub.s32 %s2448_s21, %s3089_s26  ;;  %s140_s5 = sadd.s32 1, %s2432_s17 }
  0x10   : > { %s137_s6 = sor.u32 %s136_s27, %s135_s30  ;;  %p224_p10 = pnand %p1815_p7, %p223_p9 }
  0x11   : > { %p138_p11 = scmp.eq.s32.totalorder %s137_s6, 0  ;;  %v2280_v0 = vld [vmem:[%s3062_s2 + $0x100] sm:$0xff] (!%p224_p10)   ;;  %s2557_s10 = sshll.u32 (!%p224_p10), %s2436_s18, 2  ;;  %v2283_v3 = vld [vmem:[%s3062_s2 + $0x108] sm:$0xff] (!%p224_p10)   ;;  %v2286_v6 = vld [vmem:[%s3062_s2 + $0x110] sm:$0xff] (!%p224_p10)   ;;  %vm478_vm0 = vcmask (!%p224_p10), 1042432  }
  0x12   : > { %227 = sbr.rel (%p224_p10) target bundleno = 381 (0x17d), region = 36  ;;  %v2281_v1 = vld [vmem:[%s3062_s2 + $0x140] sm:$0xff] (!%p224_p10)   ;;  %1936 = vmatprep.subr.bf16.mxu0 (!%p224_p10), %v2280_v0  ;;  %p277_p12 = scmp.lt.s32.totalorder (!%p224_p10), %s2440_s19, 1  ;;  %v2284_v4 = vld [vmem:[%s3062_s2 + $0x148] sm:$0xff] (!%p224_p10)   ;;  %v2287_v7 = vld [vmem:[%s3062_s2 + $0x150] sm:$0xff] (!%p224_p10)   ;;  %vm479_vm1 = vcmask (!%p224_p10), 1046532  }
  0x13   : > { %s2551_s7 = scalar_select %p138_p11, %s2432_s17, %s140_s5  }
  0x14   : > { %v2282_v2 = vld [vmem:[%s3062_s2 + $0xc0] sm:$0xff] (!%p224_p10)   ;;  %2092 = vmatprep.subr.bf16.mxu1 (!%p224_p10), %v2281_v1  ;;  %p279_p13 = scmp.lt.s32.totalorder (!%p224_p10), %s2557_s10, 17  ;;  %v2285_v5 = vld [vmem:[%s3062_s2 + $0xc8] sm:$0xff] (!%p224_p10)   ;;  %v2288_v8 = vld [vmem:[%s3062_s2 + $0xd0] sm:$0xff] (!%p224_p10)   ;;  %s1935_s23 = sadd.s32 (!%p224_p10), 4, %s2557_s10 }
  0x15   : > { %1937 = vmatpush3.bf16.msra.mxu0 (!%p224_p10), %v2282_v2  ;;  %2093 = vmatpush3.bf16.msra.mxu1 (!%p224_p10), %v2281_v1  ;;  %v2289_v9 = vld [vmem:[%s3062_s2 + $0x118] sm:$0xff] (!%p224_p10)   ;;  %v2292_v12 = vld [vmem:[%s3062_s2 + $0x120] sm:$0xff] (!%p224_p10)   ;;  %v2295_v15 = vld [vmem:[%s3062_s2 + $0x128] sm:$0xff] (!%p224_p10)   ;;  %p297_p0 = scmp.lt.s32.totalorder (!%p224_p10), %s1935_s23, 17  ;;  %vm355_vm2 = vsmask.f32 (!%p224_p10), 3328 }
  0x16   : > { %1938 = vmatprep.subr.bf16.mxu0 (!%p224_p10), %v2283_v3  ;;  %2094 = vmatprep.subr.bf16.mxu1 (!%p224_p10), %v2284_v4  ;;  %v2290_v10 = vld [vmem:[%s3062_s2 + $0x158] sm:$0xff] (!%p224_p10)   ;;  %v2293_v13 = vld [vmem:[%s3062_s2 + $0x160] sm:$0xff] (!%p224_p10)   ;;  %v2296_v16 = vld [vmem:[%s3062_s2 + $0x168] sm:$0xff] (!%p224_p10)   ;;  %vm356_vm3 = vsmask.f32 (!%p224_p10), 7440 }
  0x17   : > { %v2291_v11 = vld [vmem:[%s3062_s2 + $0xd8] sm:$0xff] (!%p224_p10)   ;;  %v2294_v14 = vld [vmem:[%s3062_s2 + $0xe0] sm:$0xff] (!%p224_p10)   ;;  %v2297_v17 = vld [vmem:[%s3062_s2 + $0xe8] sm:$0xff] (!%p224_p10)  }
  0x18   : > { %v2298_v18 = vld [vmem:[%s3062_s2 + $0x130] sm:$0xff] (!%p224_p10)   ;;  %v2301_v21 = vld [vmem:[%s3062_s2 + $0x138] sm:$0xff] (!%p224_p10)   ;;  %vm2650_vm4 = vmor (!%p224_p10), %vm478_vm0, %vm479_vm1 }
  0x19   : > { %s2580_s11 = scalar_select %p277_p12, %s2440_s19, 1  ;;  %1939 = vmatpush3.bf16.msra.mxu0 %v2285_v5  ;;  %2095 = vmatpush3.bf16.msra.mxu1 %v2284_v4  ;;  %v2299_v19 = vld [vmem:[%s3062_s2 + $0x170] sm:$0xff]   ;;  %v2302_v22 = vld [vmem:[%s3062_s2 + $0x178] sm:$0xff]   ;;  %v2305_v40 = vld [vmem:[%s3062_s2 + $0x40] sm:$0xff]  }
  0x1a   : > { %s280_s14 = scalar_select %p279_p13, %s2557_s10, 17  ;;  %1940 = vmatprep.subr.bf16.mxu0 %v2286_v6  ;;  %2096 = vmatprep.subr.bf16.mxu1 %v2287_v7  ;;  %v2300_v20 = vld [vmem:[%s3062_s2 + $0xf0] sm:$0xff]   ;;  %v2303_v28 = vld [vmem:[%s3062_s2 + $0xf8] sm:$0xff]   ;;  %v2306_v44 = vld [vmem:[%s3062_s2 + $0x80] sm:$0xff]  }
  0x1b   : > { %s2205_s8 = smul.u32 54, %s2580_s11  ;;  %s3091_s23 = smov (!%p297_p0, %s1935_s23), 17  ;;  %vm2667_vm5 = vmor %vm355_vm2, %vm356_vm3  ;;  %v2307_v61 = vld [vmem:[%s3062_s2] sm:$0xff]   ;;  %v2308_v0 = vld [vmem:[%s3062_s2 + $0x48] sm:$0xff]  }
  0x1c   : > { %s2204_s13 = smul.u32 3, %s280_s14  ;;  %v2309_v6 = vld [vmem:[%s3062_s2 + $0x88] sm:$0xff]   ;;  %s1922_s10 = sshll.u32 %s2440_s19, 5 }
  0x1d   : > { %1941 = vmatpush3.bf16.msra.mxu0 %v2288_v8  ;;  %2097 = vmatpush3.bf16.msra.mxu1 %v2287_v7  ;;  %s2206_s12 = smul.u32 3, %s3091_s23 }
  0x1e   : > { %1942 = vmatprep.subr.bf16.mxu0 %v2289_v9  ;;  %2098 = vmatprep.subr.bf16.mxu1 %v2290_v10  ;;  %s283_s9 = sadd.s32 %s2205_s8, %s2204_s13  ;;  %s2454_s13 = smov [#allocation3]  }
  0x1f   : > { %s1818_s27 = sshll.u32 %s283_s9, 2  ;;  %s2723_s24 = sadd.s32 %s2206_s12, %s2205_s8 }
  0x20   : > { %s2629_s9 = scalar_lea.vmem %s3060_s0, %s1818_s27  ;;  %s1821_s5 = sshll.u32 %s2723_s24, 2 }
  0x21   : > { %1943 = vmatpush3.bf16.msra.mxu0 %v2291_v11  ;;  %2099 = vmatpush3.bf16.msra.mxu1 %v2290_v10  ;;  %v312_v23 = vld [vmem:[%s2629_s9 + $0xc] sm:$0xf]  ;;  %v313_v24 = vld [vmem:[%s2629_s9 + $0x10] sm:$0xf]  ;;  %v314_v25 = vld [vmem:[%s2629_s9 + $0x14] sm:$0x1]  ;;  %s2774_s11 = scalar_lea.vmem %s3061_s1, %s1821_s5 }
  0x22   : > { %1944 = vmatprep.subr.bf16.mxu0 %v2292_v12  ;;  %2100 = vmatprep.subr.bf16.mxu1 %v2293_v13  ;;  %v383_v26 = vshrl.u32 %v312_v23, 16  ;;  %v386_v27 = vshll.u32 %v312_v23, 16  ;;  %v392_v29 = vshll.u32 %v313_v24, 16  ;;  %v396_v30 = vshrl.u32 %v313_v24, 16  ;;  %v2663_v45 = vld [vmem:[%s2629_s9 + $0x18] sm:$0xf] }
  0x23   : > { %v402_v31 = vshll.u32 %v314_v25, 16  ;;  %v1831_v35 = vrot.slane %v312_v23, 9  ;;  %v490_v36 = vrot.slane %v313_v24, 5  ;;  %v493_v39 = vrot.slane %v314_v25, 5  ;;  %v2672_v49 = vld [vmem:[%s2629_s9 + $0x1c] sm:$0xf] }
  0x24   : > { %v385_v33 = vrot.slane %v383_v26, 4  ;;  %v388_v34 = vrot.slane %v386_v27, 5  ;;  %v394_v37 = vrot.slane %v392_v29, 5  ;;  %v398_v38 = vrot.slane %v396_v30, 4  ;;  %v317_v50 = vld [vmem:[%s2629_s9 + $0x20] sm:$0x1] }
  0x25   : > { %1945 = vmatpush3.bf16.msra.mxu0 %v2294_v14  ;;  %2101 = vmatpush3.bf16.msra.mxu1 %v2293_v13  ;;  %v491_v42 = vsel %vm2650_vm4, %v1831_v35, %v490_v36  ;;  %v492_v43 = vrot.slane %v490_v36, 4  ;;  %v404_v48 = vrot.slane %v402_v31, 5  ;;  %v1832_v51 = vrot.slane %v2663_v45, 9  ;;  %v2310_v12 = vld [vmem:[%s3062_s2 + $0x8] sm:$0xff]   ;;  %v2315_v26 = vld [vmem:[%s3062_s2 + $0x58] sm:$0xff]   ;;  %s1933_s27 = sshll.u32 %s2436_s18, 3 }
  0x26   : > { %1946 = vmatprep.subr.bf16.mxu0 %v2295_v15  ;;  %2102 = vmatprep.subr.bf16.mxu1 %v2296_v16  ;;  %v389_v41 = vor.u32 %v388_v34, %v385_v33  ;;  %v399_v47 = vor.u32 %v398_v38, %v394_v37  ;;  %v497_v54 = vrot.slane %v2672_v49, 5  ;;  %v500_v55 = vrot.slane %v317_v50, 5  ;;  %v2312_v15 = vld [vmem:[%s3062_s2 + $0x50] sm:$0xff]   ;;  %v2316_v27 = vld [vmem:[%s3062_s2 + $0x98] sm:$0xff]   ;;  %s1700_s6 = sadd.s32 %s1933_s27, %s1922_s10  ;;  %s2362_s23 = sshll.u32 %s2454_s13, 4  ;;  %s2363_s23 = int_to_ptr.vmem [resolvable:$false] %s2362_s23 }
  0x27   : > { %v494_v53 = vsel %vm2650_vm4, %v492_v43, %v493_v39  ;;  %v2691_v63 = vcombine.low %v312_v23, %v313_v24  ;;  %v407_v3 = vshrl.u32 %v2663_v45, 16  ;;  %v410_v4 = vshll.u32 %v2663_v45, 16  ;;  %v2733_v23 = vld [vmem:[%s2629_s9 + $0x24] sm:$0xf]  ;;  %v2736_v24 = vld [vmem:[%s2629_s9 + $0x28] sm:$0xf] }
  0x28   : > { %v390_v52 = vrot.slane %v389_v41, 4  ;;  %v400_v56 = vrot.slane %v399_v47, 4  ;;  %v2679_v57 = vcombine.low %v491_v42, %v494_v53  ;;  %v498_v59 = vsel %vm2650_vm4, %v1832_v51, %v497_v54  ;;  %v2317_v38 = vld [vmem:[%s3062_s2 + $0x18] sm:$0xff]   ;;  %v2319_v43 = vld [vmem:[%s3062_s2 + $0x60] sm:$0xff]   ;;  %s1923_s18 = sshll.u32 %s1700_s6, 7  ;;  %s2364_s8 = scalar_lea.vmem %s2363_s23, 2048 }
  0x29   : > { %1947 = vmatpush3.bf16.msra.mxu0 %v2297_v17  ;;  %2103 = vmatpush3.bf16.msra.mxu1 %v2296_v16  ;;  %v499_v60 = vrot.slane %v497_v54, 4  ;;  %v416_v7 = vshll.u32 %v2672_v49, 16  ;;  %v420_v8 = vshrl.u32 %v2672_v49, 16  ;;  %v426_v9 = vshll.u32 %v317_v50, 16  ;;  %v2321_v50 = vld [vmem:[%s3062_s2 + $0x20] sm:$0xff]   ;;  %s3000_s14 = scalar_lea.hbm %s3064_s4, %s1923_s18 }
  0x2a   : > { %1948 = vmatprep.subr.bf16.mxu0 %v2298_v18  ;;  %2104 = vmatprep.subr.bf16.mxu1 %v2299_v19  ;;  %v395_v58 = vsel %vm2667_vm5, %v390_v52, %v394_v37  ;;  %v405_v62 = vsel %vm2667_vm5, %v400_v56, %v404_v48  ;;  %v409_v10 = vrot.slane %v407_v3, 4  ;;  %v412_v11 = vrot.slane %v410_v4, 5  ;;  %v2320_v48 = vld [vmem:[%s3062_s2 + $0xa0] sm:$0xff]   ;;  %v2322_v56 = vld [vmem:[%s3062_s2 + $0x68] sm:$0xff]  }
  0x2b   : > { %2108 = vmatprep.mubr.bf16.mxu1 %v2679_v57  ;;  %v2697_v1 = vcombine.low %v395_v58, %v405_v62  ;;  %v501_v2 = vsel %vm2650_vm4, %v499_v60, %v500_v55  ;;  %v418_v13 = vrot.slane %v416_v7, 5  ;;  %v422_v14 = vrot.slane %v420_v8, 4  ;;  %v321_v52 = vld [vmem:[%s2774_s11] sm:$0xf]  ;;  %v322_v53 = vld [vmem:[%s2774_s11 + $0x4] sm:$0xf] }
  0x2c   : > { %v2703_v5 = vcombine.low %v498_v59, %v501_v2  ;;  %v413_v16 = vor.u32 %v412_v11, %v409_v10  ;;  %v428_v18 = vrot.slane %v426_v9, 5  ;;  %v431_v29 = vshrl.u32 %v2733_v23, 16  ;;  %v2323_v58 = vld [vmem:[%s3062_s2 + $0xa8] sm:$0xff]  }
  0x2d   : > { %1949 = vmatpush3.bf16.msra.mxu0 %v2300_v20  ;;  %2105 = vmatpush3.bf16.msra.mxu1 %v2299_v19  ;;  %v423_v17 = vor.u32 %v422_v14, %v418_v13  ;;  %v2313_v19 = vld [vmem:[%s3062_s2 + $0x90] sm:$0xff]   ;;  %v434_v30 = vshll.u32 %v2733_v23, 16  ;;  %v440_v31 = vshll.u32 %v2736_v24, 16  ;;  %v2756_v34 = vcombine.low %v2663_v45, %v2672_v49  ;;  %v323_v59 = vld [vmem:[%s2774_s11 + $0x8] sm:$0x1] }
  0x2e   : > { %1950 = vmatprep.subr.bf16.mxu0 %v2301_v21  ;;  %2106 = vmatprep.subr.bf16.mxu1 %v2302_v22  ;;  %v414_v20 = vrot.slane %v413_v16, 4  ;;  %v444_v35 = vshrl.u32 %v2736_v24, 16  ;;  %v433_v39 = vrot.slane %v431_v29, 4  ;;  %v1833_v54 = vrot.slane %v2733_v23, 9  ;;  %v2324_v7 = vld [vmem:[%s3062_s2 + $0x28] sm:$0xff]   ;;  %v2326_v14 = vld [vmem:[%s3062_s2 + $0x70] sm:$0xff]  }
  0x2f   : > { %883 = vmatprep.mubr.bf16.mxu0 %v2697_v1  ;;  %v424_v21 = vrot.slane %v423_v17, 4  ;;  %v442_v41 = vrot.slane %v440_v31, 5  ;;  %v600_v60 = vshrl.u32 %v321_v52, 16  ;;  %v609_v62 = vshll.u32 %v322_v53, 16  ;;  %v2327_v16 = vld [vmem:[%s3062_s2 + $0xb0] sm:$0xff]  }
  0x30   : > { %v419_v25 = vsel %vm2667_vm5, %v414_v20, %v418_v13  ;;  %v446_v42 = vrot.slane %v444_v35, 4  ;;  %v2799_v2 = vcombine.low %v2733_v23, %v2736_v24  ;;  %v613_v3 = vshrl.u32 %v322_v53, 16  ;;  %v2328_v29 = vld [vmem:[%s3062_s2 + $0x30] sm:$0xff]  }
  0x31   : > { %1951 = vmatpush3.bf16.msra.mxu0 %v2303_v28  ;;  %2107 = vmatpush3.bf16.msra.mxu1 %v2302_v22  ;;  %v2314_v22 = vld [vmem:[%s3062_s2 + $0x10] sm:$0xff]   ;;  %v2747_v28 = vld [vmem:[%s2629_s9 + $0x2c] sm:$0x1]  ;;  %v429_v33 = vsel %vm2667_vm5, %v424_v21, %v428_v18  ;;  %v619_v4 = vshll.u32 %v323_v59, 16  ;;  %v602_v8 = vrot.slane %v600_v60, 4  ;;  %v611_v10 = vrot.slane %v609_v62, 5 }
  0x32   : > { %1988 = vmatprep.subr.bf16.mxu0 %v2305_v40  ;;  %2116 = vmatprep.subr.bf16.mxu1 %v2306_v44  ;;  %v450_v36 = vshll.u32 %v2747_v28, 16  ;;  %v2760_v37 = vcombine.low %v419_v25, %v429_v33  ;;  %v436_v40 = vrot.slane %v434_v30, 5  ;;  %v447_v45 = vor.u32 %v446_v42, %v442_v41  ;;  %v311_v42 = vld [vmem:[%s2629_s9 + $0x8] sm:$0x1]  ;;  %v2334_v62 = vld [vmem:[%s3062_s2 + $0x200] sm:$0xff]  }
  0x33   : > { %v615_v11 = vrot.slane %v613_v3, 4  ;;  %v507_v13 = vrot.slane %v2747_v28, 5  ;;  %v1840_v17 = vrot.slane %v321_v52, 9  ;;  %v634_v18 = vrot.slane %v322_v53, 5 }
  0x34   : > { %884 = vmatmul.mubr.bf16.vlgmr.msra.gmra.mrb[0].mxu0 %v2691_v63  ;;  %2109 = vmatmul.mubr.bf16.vlgmr.msra.gmra.mrb[0].mxu1 %v2703_v5  ;;  %v452_v47 = vrot.slane %v450_v36, 5  ;;  %v448_v51 = vrot.slane %v447_v45, 4  ;;  %v621_v21 = vrot.slane %v619_v4, 5  ;;  %v2827_v31 = vcombine.low %v321_v52, %v322_v53  ;;  %v2329_v36 = vld [vmem:[%s3062_s2 + $0x78] sm:$0xff]  }
  0x35   : > { %1989 = vmatpush3.bf16.msra.mxu0 %v2307_v61  ;;  %2117 = vmatpush3.bf16.msra.mxu1 %v2306_v44  ;;  %v437_v44 = vor.u32 %v436_v40, %v433_v39  ;;  %v603_v61 = vshll.u32 %v321_v52, 16  ;;  %v616_v20 = vor.u32 %v615_v11, %v611_v10  ;;  %v635_v25 = vsel %vm2650_vm4, %v1840_v17, %v634_v18  ;;  %v2335_v17 = vld [vmem:[%s3062_s2 + $0x180] sm:$0xff]  }
  0x36   : > { %1990 = vmatprep.subr.bf16.mxu0 %v2308_v0  ;;  %2118 = vmatprep.subr.bf16.mxu1 %v2309_v6  ;;  %v453_v0 = vsel %vm2667_vm5, %v448_v51, %v452_v47  ;;  %v2330_v47 = vld [vmem:[%s3062_s2 + $0xb8] sm:$0xff]  }
  0x37   : > { %891 = vmatprep.mubr.bf16.mxu0 %v2760_v37  ;;  %v438_v49 = vrot.slane %v437_v44, 4  ;;  %v605_v9 = vrot.slane %v603_v61, 5  ;;  %v2331_v51 = vld [vmem:[%s3062_s2 + $0x38] sm:$0xff]   ;;  %v486_v61 = vrot.slane %v311_v42, 5 }
  0x39   : > { %1991 = vmatpush3.bf16.msra.mxu0 %v2310_v12  ;;  %2119 = vmatpush3.bf16.msra.mxu1 %v2309_v6  ;;  %v443_v55 = vsel %vm2667_vm5, %v438_v49, %v442_v41  ;;  %v504_v12 = vrot.slane %v2736_v24, 5  ;;  %v310_v41 = vld [vmem:[%s2629_s9 + $0x4] sm:$0xf] }
  0x3a   : > { %1992 = vmatprep.subr.bf16.mxu0 %v2312_v15  ;;  %2120 = vmatprep.subr.bf16.mxu1 %v2313_v19  ;;  %v2801_v6 = vcombine.low %v443_v55, %v453_v0  ;;  %v606_v15 = vor.u32 %v605_v9, %v602_v8  ;;  %v372_v49 = vshrl.u32 %v310_v41, 16 }
  0x3b   : > { %v506_v23 = vrot.slane %v504_v12, 4 }
  0x3c   : > { %892 = vmatmul.mubr.bf16.gmra.mrb[4].mxu0 %v2756_v34  ;;  %v607_v24 = vrot.slane %v606_v15, 4  ;;  %v2337_v15 = vld [vmem:[%s3062_s2 + $0x208] sm:$0xff]  }
  0x3d   : > { %1993 = vmatpush3.bf16.msra.mxu0 %v2314_v22  ;;  %2121 = vmatpush3.bf16.msra.mxu1 %v2313_v19  ;;  %v637_v19 = vrot.slane %v323_v59, 5  ;;  %v505_v22 = vsel %vm2650_vm4, %v1833_v54, %v504_v12  ;;  %v508_v28 = vsel %vm2650_vm4, %v506_v23, %v507_v13  ;;  %v2333_v59 = vld [vmem:[%s3062_s2 + $0x1c0] sm:$0xff]  }
  0x3e   : > { %1994 = vmatprep.subr.bf16.mxu0 %v2315_v26  ;;  %2122 = vmatprep.subr.bf16.mxu1 %v2316_v27  ;;  %v636_v26 = vrot.slane %v634_v18, 4  ;;  %v612_v30 = vsel %vm2667_vm5, %v607_v24, %v611_v10  ;;  %v2829_v33 = vcombine.low %v505_v22, %v508_v28  ;;  %v2336_v18 = vld [vmem:[%s3062_s2 + $0x1c8] sm:$0xff]   ;;  %v2341_v22 = vld [vmem:[%s3062_s2 + $0x190] sm:$0xff]   ;;  %v2346_v23 = vld [vmem:[%s3062_s2 + $0x220] sm:$0xff]  }
  0x3f   : > { %899 = vmatprep.mubr.bf16.mxu0 %v2801_v6  ;;  %v2344_v24 = vld [vmem:[%s3062_s2 + $0x198] sm:$0xff]   ;;  %v2350_v28 = vld [vmem:[%s3062_s2 + $0x1a8] sm:$0xff]  }
  0x40   : > { %v638_v35 = vsel %vm2650_vm4, %v636_v26, %v637_v19  ;;  %2112 = vmatprep.mubr.bf16.mxu1 %v2829_v33  ;;  %v2340_v19 = vld [vmem:[%s3062_s2 + $0x210] sm:$0xff]   ;;  %v2348_v26 = vld [vmem:[%s3062_s2 + $0x1e8] sm:$0xff]  }
  0x41   : > { %1995 = vmatpush3.bf16.msra.mxu0 %v2317_v38  ;;  %2123 = vmatpush3.bf16.msra.mxu1 %v2316_v27  ;;  %v617_v27 = vrot.slane %v616_v20, 4  ;;  %v309_v38 = vld [vmem:[%s2629_s9] sm:$0xf]  ;;  %v2839_v40 = vcombine.low %v635_v25, %v638_v35  ;;  %v2338_v20 = vld [vmem:[%s3062_s2 + $0x188] sm:$0xff]   ;;  %v325_v35 = vld [vmem:[%s2774_s11 + $0x10] sm:$0xf] }
  0x42   : > { %1996 = vmatprep.subr.bf16.mxu0 %v2319_v43  ;;  %2124 = vmatprep.subr.bf16.mxu1 %v2320_v48  ;;  %v359_v43 = vshrl.u32 %v309_v38, 16  ;;  %v362_v44 = vshll.u32 %v309_v38, 16  ;;  %v1830_v54 = vrot.slane %v309_v38, 9  ;;  %v2345_v25 = vld [vmem:[%s3062_s2 + $0x1e0] sm:$0xff]  }
  0x43   : > { %v622_v39 = vsel %vm2667_vm5, %v617_v27, %v621_v21  ;;  %2113 = vmatmul.mubr.bf16.gmra.mrb[4].mxu1 %v2839_v40  ;;  %v2343_v21 = vld [vmem:[%s3062_s2 + $0x218] sm:$0xff]   ;;  %v2352_v27 = vld [vmem:[%s3062_s2 + $0x230] sm:$0xff]  }
  0x44   : > { %900 = vmatmul.mubr.bf16.gmra.mrb[8].mxu0 %v2799_v2  ;;  %v2843_v45 = vcombine.low %v612_v30, %v622_v39  ;;  %v361_v52 = vrot.slane %v359_v43, 4  ;;  %v364_v53 = vrot.slane %v362_v44, 5  ;;  %v2355_v30 = vld [vmem:[%s3062_s2 + $0x238] sm:$0xff]   ;;  %v1300_v39 = vrot.slane %v325_v35, 5 }
  0x45   : > { %1997 = vmatpush3.bf16.msra.mxu0 %v2321_v50  ;;  %2125 = vmatpush3.bf16.msra.mxu1 %v2320_v48  ;;  %v368_v48 = vshll.u32 %v310_v41, 16  ;;  %v378_v50 = vshll.u32 %v311_v42, 16  ;;  %v326_v42 = vld [vmem:[%s2774_s11 + $0x14] sm:$0x1]  ;;  %v2356_v43 = vld [vmem:[%s3062_s2 + $0x1b8] sm:$0xff]  }
  0x46   : > { %1998 = vmatprep.subr.bf16.mxu0 %v2322_v56  ;;  %2126 = vmatprep.subr.bf16.mxu1 %v2323_v58  ;;  %v374_v56 = vrot.slane %v372_v49, 4  ;;  %v365_v60 = vor.u32 %v364_v53, %v361_v52  ;;  %v1279_v49 = vshrl.u32 %v325_v35, 16  ;;  %v1303_v52 = vrot.slane %v326_v42, 5 }
  0x47   : > { %907 = vmatprep.mubr.bf16.mxu0 %v2843_v45  ;;  %v370_v55 = vrot.slane %v368_v48, 5  ;;  %v380_v3 = vrot.slane %v378_v50, 5  ;;  %v1275_v48 = vshll.u32 %v325_v35, 16 }
  0x48   : > { %v366_v8 = vrot.slane %v365_v60, 4 }
  0x49   : > { %1999 = vmatpush3.bf16.msra.mxu0 %v2324_v7  ;;  %2127 = vmatpush3.bf16.msra.mxu1 %v2323_v58  ;;  %v483_v58 = vrot.slane %v310_v41, 5  ;;  %v375_v0 = vor.u32 %v374_v56, %v370_v55  ;;  %v1281_v56 = vrot.slane %v1279_v49, 4 }
  0x4a   : > { %2000 = vmatprep.subr.bf16.mxu0 %v2326_v14  ;;  %2128 = vmatprep.subr.bf16.mxu1 %v2327_v16  ;;  %v371_v11 = vsel %vm2667_vm5, %v366_v8, %v370_v55  ;;  %v1822_v14 = vcombine.low %v309_v38, %v310_v41  ;;  %v2354_v38 = vld [vmem:[%s3062_s2 + $0x1f8] sm:$0xff]   ;;  %v324_v41 = vld [vmem:[%s2774_s11 + $0xc] sm:$0xf]  ;;  %v1277_v55 = vrot.slane %v1275_v48, 5  ;;  %s268_s11 = sand.u32 1, %s2428_s16  }
  0x4b   : > { %v484_v4 = vsel %vm2650_vm4, %v1830_v54, %v483_v58  ;;  %v485_v7 = vrot.slane %v483_v58, 4  ;;  %v376_v9 = vrot.slane %v375_v0, 4  ;;  %v1266_v44 = vshrl.u32 %v324_v41, 16  ;;  %s1816_s12 = sshll.u32 %s268_s11, 6  ;;  %s3008_s25 = scalar_lea.sflag [#allocation4], %s268_s11 }
  0x4c   : > { %908 = vmatmul.mubr.bf16.gmra.mrb[12].mxu0 %v2827_v31  ;;  %v1892_v50 = vrot.slane %v324_v41, 9  ;;  %s2978_s5 = scalar_lea.vmem [#allocation3], %s1816_s12 }
  0x4d   : > { %2001 = vmatpush3.bf16.msra.mxu0 %v2328_v29  ;;  %2129 = vmatpush3.bf16.msra.mxu1 %v2327_v16  ;;  %v487_v10 = vsel %vm2650_vm4, %v485_v7, %v486_v61  ;;  %v381_v13 = vsel %vm2667_vm5, %v376_v9, %v380_v3  ;;  %v2351_v29 = vld [vmem:[%s3062_s2 + $0x1f0] sm:$0xff]   ;;  %v1268_v53 = vrot.slane %v1266_v44, 4  ;;  %v1282_v61 = vor.u32 %v1281_v56, %v1277_v55  ;;  %s1703_s19 = sshll.u32 %s2978_s5, 4  ;;  %s3002_s19 = int_to_ptr.vmem [resolvable:$true] %s1703_s19 }
  0x4e   : > { %2002 = vmatprep.subr.bf16.mxu0 %v2329_v36  ;;  %2130 = vmatprep.subr.bf16.mxu1 %v2330_v47  ;;  %v1834_v12 = vcombine.low %v484_v4, %v487_v10  ;;  %v1826_v16 = vcombine.low %v371_v11, %v381_v13  ;;  %v2353_v36 = vld [vmem:[%s3062_s2 + $0x1b0] sm:$0xff]   ;;  %s2358_s30 = scalar_lea.vmem %s3002_s19, 1024  ;;  %p2365_p5 = scmp.lt.s32.totalorder %s3002_s19, %s2363_s23 }
  0x4f   : > { %v1283_v0 = vrot.slane %v1282_v61, 4  ;;  %p2359_p1 = scmp.ne.s32.totalorder %s3002_s19, %s2358_s30  ;;  %p2366_p6 = scmp.lt.s32.totalorder %s2364_s8, %s2358_s30 }
  0x50   : > { %2132 = vmatprep.mubr.bf16.mxu1 %v1834_v12  ;;  %1157 = vmatprep.mubr.bf16.mxu0 %v1826_v16 }
  0x51   : > { %2003 = vmatpush3.bf16.msra.mxu0 %v2331_v51  ;;  %2131 = vmatpush3.bf16.msra.mxu1 %v2330_v47  ;;  %v1269_v47 = vshll.u32 %v324_v41, 16  ;;  %v1302_v51 = vrot.slane %v1300_v39, 4  ;;  %p2360_p2 = pnand %p2359_p1, %p2533_p3  ;;  %p2367_p7 = por %p2366_p6, %p2365_p5 }
  0x52   : > { %2040 = vmatprep.subr.bf16.mxu0 %v2333_v59  ;;  %2140 = vmatprep.subr.bf16.mxu1 %v2334_v62 }
  0x53   : > { %v1271_v54 = vrot.slane %v1269_v47, 5  ;;  %v1304_v58 = vsel %vm2650_vm4, %v1302_v51, %v1303_v52  ;;  %p2361_p4 = pneg %p2360_p2 }
  0x54   : > { %2133 = vmatmul.mubr.bf16.vlgmr.msra.gmra.mrb[0].mxu1 %v2679_v57  ;;  %1158 = vmatmul.mubr.bf16.vlgmr.msra.gmra.mrb[16].mxu0 %v1822_v14  ;;  %v2339_v57 = vld [vmem:[%s3062_s2 + $0x1d0] sm:$0xff]  }
  0x55   : > { %2141 = vmatpush3.bf16.msra.mxu1 %v2334_v62  ;;  %2041 = vmatpush3.bf16.msra.mxu0 %v2335_v17  ;;  %v1272_v60 = vor.u32 %v1271_v54, %v1268_v53  ;;  %p2368_p9 = pnand %p2367_p7, %p2361_p4 }
  0x56   : > { %2142 = vmatprep.subr.bf16.mxu1 %v2337_v15  ;;  %1165 = vmatprep.mubr.bf16.mxu0 %v2697_v1  ;;  %v2342_v1 = vld [vmem:[%s3062_s2 + $0x1d8] sm:$0xff]  }
  0x57   : > { %2042 = vmatprep.subr.bf16.mxu0 %v2336_v18  ;;  %2136 = vmatprep.mubr.bf16.mxu1 %v2703_v5  ;;  %v1273_v62 = vrot.slane %v1272_v60, 4 }
  0x59   : > { %2143 = vmatpush3.bf16.msra.mxu1 %v2337_v15  ;;  %2043 = vmatpush3.bf16.msra.mxu0 %v2338_v20  ;;  %v1278_v32 = vsel %vm2667_vm5, %v1273_v62, %v1277_v55 }
  0x5a   : > { %2144 = vmatprep.subr.bf16.mxu1 %v2340_v19  ;;  %2044 = vmatprep.subr.bf16.mxu0 %v2339_v57 }
  0x5c   : > { %2137 = vmatmul.mubr.bf16.gmra.mrb[4].mxu1 %v2829_v33  ;;  %1166 = vmatmul.mubr.bf16.gmra.mrb[20].mxu0 %v2691_v63  ;;  %v2349_v63 = vld [vmem:[%s3062_s2 + $0x228] sm:$0xff]  }
  0x5d   : > { %2145 = vmatpush3.bf16.msra.mxu1 %v2340_v19  ;;  %2156 = vmatprep.mubr.bf16.mxu1 %v2703_v5  ;;  %v2347_v5 = vld [vmem:[%s3062_s2 + $0x1a0] sm:$0xff]  }
  0x5e   : > { %2146 = vmatprep.subr.bf16.mxu1 %v2343_v21  ;;  %2045 = vmatpush3.bf16.msra.mxu0 %v2341_v22 }
  0x5f   : > { %1173 = vmatprep.mubr.bf16.mxu0 %v2760_v37  ;;  %2046 = vmatprep.subr.bf16.mxu0 %v2342_v1 }
  0x61   : > { %2147 = vmatpush3.bf16.msra.mxu1 %v2343_v21 }
  0x62   : > { %2148 = vmatprep.subr.bf16.mxu1 %v2346_v23  ;;  %2047 = vmatpush3.bf16.msra.mxu0 %v2344_v24 }
  0x63   : > { %2048 = vmatprep.subr.bf16.mxu0 %v2345_v25 }
  0x64   : > { %1174 = vmatmul.mubr.bf16.gmra.mrb[24].mxu0 %v2756_v34 }
  0x65   : > { %2149 = vmatpush3.bf16.msra.mxu1 %v2346_v23  ;;  %1181 = vmatprep.mubr.bf16.mxu0 %v2801_v6 }
  0x66   : > { %2150 = vmatprep.subr.bf16.mxu1 %v2349_v63  ;;  %2049 = vmatpush3.bf16.msra.mxu0 %v2347_v5 }
  0x67   : > { %2050 = vmatprep.subr.bf16.mxu0 %v2348_v26 }
  0x69   : > { %2151 = vmatpush3.bf16.msra.mxu1 %v2349_v63 }
  0x6a   : > { %2152 = vmatprep.subr.bf16.mxu1 %v2352_v27  ;;  %2051 = vmatpush3.bf16.msra.mxu0 %v2350_v28 }
  0x6b   : > { %2052 = vmatprep.subr.bf16.mxu0 %v2351_v29 }
  0x6c   : > { %1182 = vmatmul.mubr.bf16.gmra.mrb[28].mxu0 %v2799_v2 }
  0x6d   : > { %2153 = vmatpush3.bf16.msra.mxu1 %v2352_v27  ;;  %1549 = vmatprep.mubr.bf16.mxu0 %v2760_v37  ;;  %v1301_v37 = vsel %vm2650_vm4, %v1892_v50, %v1300_v39 }
  0x6e   : > { %2154 = vmatprep.subr.bf16.mxu1 %v2355_v30  ;;  %2053 = vmatpush3.bf16.msra.mxu0 %v2353_v36  ;;  %v1893_v59 = vcombine.low %v1301_v37, %v1304_v58 }
  0x6f   : > { %2054 = vmatprep.subr.bf16.mxu0 %v2354_v38 }
  0x71   : > { %2155 = vmatpush3.bf16.msra.mxu1 %v2355_v30 }
  0x72   : > { %2055 = vmatpush3.bf16.msra.mxu0 %v2356_v43 }
  0x74   : > { %2157 = vmatmul.mubr.bf16.vlgmr.msra.gmra.mrb[0].mxu1 %v2829_v33  ;;  %v1285_v33 = vshll.u32 %v326_v42, 16 }
  0x75   : > { %2160 = vmatprep.mubr.bf16.mxu1 %v2839_v40  ;;  %1550 = vmatmul.mubr.bf16.vlgmr.msra.gmra.mrb[32].mxu0 %v2756_v34 }
  0x76   : > { %1557 = vmatprep.mubr.bf16.mxu0 %v2801_v6  ;;  %v1287_v3 = vrot.slane %v1285_v33, 5  ;;  %v1890_v6 = vcombine.low %v324_v41, %v325_v35 }
  0x78   : > { %v1288_v34 = vsel %vm2667_vm5, %v1283_v0, %v1287_v3 }
  0x79   : > { %v1891_v40 = vcombine.low %v1278_v32, %v1288_v34 }
  0x7c   : > { %2161 = vmatmul.mubr.bf16.gmra.mrb[4].mxu1 %v1893_v59 }
  0x7d   : > { %1558 = vmatmul.mubr.bf16.gmra.mrb[36].mxu0 %v2799_v2 }
  0x7e   : > { %1565 = vmatprep.mubr.bf16.mxu0 %v2843_v45 }
  0x85   : > { %1566 = vmatmul.mubr.bf16.gmra.mrb[40].mxu0 %v2827_v31 }
  0x86   : > { %1573 = vmatprep.mubr.bf16.mxu0 %v1891_v40 }
  0x8d   : > { %1574 = vmatmul.mubr.bf16.gmra.mrb[44].mxu0 %v1890_v6 }
 0x107   : > { %v1952_v4 = vpop.f32.mrb[0].mxu0 }
 0x108   : > { %v1953_v7 = vpop.f32.mrb[1].mxu0 }
 0x109   : > { %v1954_v8 = vadd.f32 %v1953_v7, %v1952_v4  ;;  %v1955_v9 = vpop.f32.mrb[2].mxu0 }
 0x10a   : > { %v1956_v10 = vpop.f32.mrb[3].mxu0 }
 0x10b   : > { %v1957_v2 = vadd.f32 %v1956_v10, %v1955_v9  ;;  %v2972_v9 = vld [vmem:[%s3063_s3] ss:$0 sm:$0xff] }
 0x10f   : > { %v1958_v11 = vpop.f32.mrb[4].mxu0 }
 0x110   : > { %v1959_v45 = vpop.f32.mrb[5].mxu0 }
 0x111   : > { %v1960_v12 = vadd.f32 %v1959_v45, %v1958_v11  ;;  %v1961_v13 = vpop.f32.mrb[6].mxu0 }
 0x112   : > { %v1962_v14 = vpop.f32.mrb[7].mxu0 }
 0x113   : > { %v1963_v15 = vadd.f32 %v1962_v14, %v1961_v13 }
 0x117   : > { %v1964_v46 = vpop.f32.mrb[8].mxu0 }
 0x118   : > { %v1965_v16 = vpop.f32.mrb[9].mxu0 }
 0x119   : > { %v1966_v17 = vadd.f32 %v1965_v16, %v1964_v46  ;;  %v1967_v18 = vpop.f32.mrb[10].mxu0 }
 0x11a   : > { %v1968_v31 = vpop.f32.mrb[11].mxu0 }
 0x11b   : > { %v1969_v19 = vadd.f32 %v1968_v31, %v1967_v18 }
 0x11f   : > { %v1970_v20 = vpop.f32.mrb[12].mxu0 }
 0x120   : > { %v1971_v57 = vpop.f32.mrb[13].mxu0 }
 0x121   : > { %v1972_v21 = vadd.f32 %v1971_v57, %v1970_v20  ;;  %v1973_v22 = vpop.f32.mrb[14].mxu0 }
 0x122   : > { %v1974_v1 = vpop.f32.mrb[15].mxu0 }
 0x123   : > { %v1975_v23 = vadd.f32 %v1974_v1, %v1973_v22 }
 0x127   : > { %v2004_v24 = vpop.f32.mrb[16].mxu0 }
 0x128   : > { %v2005_v25 = vpop.f32.mrb[17].mxu0 }
 0x129   : > { %v2006_v63 = vadd.f32 %v2005_v25, %v2004_v24  ;;  %v2007_v5 = vpop.f32.mrb[18].mxu0 }
 0x12a   : > { %v2008_v26 = vpop.f32.mrb[19].mxu0 }
 0x12b   : > { %v2167_v27 = vadd.f32 %v2006_v63, %v1954_v8  ;;  %v2009_v28 = vadd.f32 %v2008_v26, %v2007_v5 }
 0x12d   : > { %v2173_v29 = vadd.f32 %v2009_v28, %v1957_v2 }
 0x12f   : > { %v2010_v30 = vpop.f32.mrb[20].mxu0 }
 0x130   : > { %v2011_v35 = vpop.f32.mrb[21].mxu0 }
 0x131   : > { %v2012_v36 = vadd.f32 %v2011_v35, %v2010_v30  ;;  %v2013_v38 = vpop.f32.mrb[22].mxu0 }
 0x132   : > { %v2014_v39 = vpop.f32.mrb[23].mxu0 }
 0x133   : > { %v2164_v41 = vadd.f32 %v2012_v36, %v1960_v12  ;;  %v2015_v42 = vadd.f32 %v2014_v39, %v2013_v38 }
 0x135   : > { %v2170_v43 = vadd.f32 %v2015_v42, %v1963_v15 }
 0x137   : > { %v2016_v44 = vpop.f32.mrb[24].mxu0 }
 0x138   : > { %v2017_v47 = vpop.f32.mrb[25].mxu0 }
 0x139   : > { %v2018_v48 = vadd.f32 %v2017_v47, %v2016_v44  ;;  %v2019_v49 = vpop.f32.mrb[26].mxu0 }
 0x13a   : > { %v2020_v50 = vpop.f32.mrb[27].mxu0 }
 0x13b   : > { %v2179_v51 = vadd.f32 %v2018_v48, %v1966_v17  ;;  %v2021_v52 = vadd.f32 %v2020_v50, %v2019_v49 }
 0x13d   : > { %v2185_v53 = vadd.f32 %v2021_v52, %v1969_v19 }
 0x13f   : > { %v2022_v54 = vpop.f32.mrb[28].mxu0 }
 0x140   : > { %v2023_v55 = vpop.f32.mrb[29].mxu0 }
 0x141   : > { %v2024_v56 = vadd.f32 %v2023_v55, %v2022_v54  ;;  %v2025_v37 = vpop.f32.mrb[30].mxu0 }
 0x142   : > { %v2026_v58 = vpop.f32.mrb[31].mxu0 }
 0x143   : > { %v2964_v59 = vadd.f32 %v2024_v56, %v1972_v21  ;;  %v2027_v60 = vadd.f32 %v2026_v58, %v2025_v37 }
 0x145   : > { %v2966_v61 = vadd.f32 %v2027_v60, %v1975_v23 }
 0x147   : > { %v2158_v33 = vpop.f32.mrb[0].mxu1 }
 0x148   : > { %v1616_v62 = vpop.f32.mrb[1].mxu1  ;;  %v2056_v0 = vpop.f32.mrb[32].mxu0 }
 0x149   : > { %v2159_v3 = vpop.f32.mrb[2].mxu1  ;;  %v2057_v32 = vpop.f32.mrb[33].mxu0 }
 0x14a   : > { %v1619_v34 = vpop.f32.mrb[3].mxu1  ;;  %v2058_v40 = vadd.f32 %v2057_v32, %v2056_v0  ;;  %v2059_v6 = vpop.f32.mrb[34].mxu0 }
 0x14b   : > { %v2060_v4 = vpop.f32.mrb[35].mxu0 }
 0x14c   : > { %v2168_v7 = vadd.f32 %v2167_v27, %v2058_v40  ;;  %v2061_v8 = vadd.f32 %v2060_v4, %v2059_v6 }
 0x14e   : > { %v2169_v10 = vadd.f32 %v2168_v7, %v1616_v62  ;;  %v2174_v2 = vadd.f32 %v2173_v29, %v2061_v8 }
 0x14f   : > { %v2162_v11 = vpop.f32.mrb[4].mxu1 }
 0x150   : > { %v1632_v45 = vpop.f32.mrb[5].mxu1  ;;  %v1662_v12 = vadd.f32 %v2169_v10, %v2972_v9  ;;  %v2175_v13 = vadd.f32 %v2174_v2, %v1619_v34  ;;  %v2062_v14 = vpop.f32.mrb[36].mxu0 }
 0x151   : > { %v2163_v15 = vpop.f32.mrb[6].mxu1  ;;  %v2063_v46 = vpop.f32.mrb[37].mxu0 }
 0x152   : > { %v1635_v16 = vpop.f32.mrb[7].mxu1  ;;  %v1670_v17 = vmax.f32 %v1662_v12, 0.0  ;;  %v1663_v18 = vadd.f32 %v2175_v13, %v2972_v9  ;;  %v2064_v31 = vadd.f32 %v2063_v46, %v2062_v14  ;;  %v2065_v19 = vpop.f32.mrb[38].mxu0 }
 0x153   : > { %v2066_v20 = vpop.f32.mrb[39].mxu0 }
 0x154   : > { %1678 = vst [vmem:[%s2978_s5] sm:$0xff] %v1670_v17  ;;  %v1671_v57 = vmax.f32 %v1663_v18, 0.0  ;;  %v2165_v21 = vadd.f32 %v2164_v41, %v2064_v31  ;;  %v2067_v22 = vadd.f32 %v2066_v20, %v2065_v19 }
 0x156   : > { %1679 = vst [vmem:[%s2978_s5 + $0x8] sm:$0xff] %v1671_v57  ;;  %v2166_v1 = vadd.f32 %v2165_v21, %v2158_v33  ;;  %v2171_v23 = vadd.f32 %v2170_v43, %v2067_v22 }
 0x158   : > { %v1664_v24 = vadd.f32 %v2166_v1, %v2972_v9  ;;  %v2172_v25 = vadd.f32 %v2171_v23, %v2159_v3  ;;  %v2068_v63 = vpop.f32.mrb[40].mxu0 }
 0x159   : > { %v2069_v5 = vpop.f32.mrb[41].mxu0 }
 0x15a   : > { %v1672_v26 = vmax.f32 %v1664_v24, 0.0  ;;  %v1665_v27 = vadd.f32 %v2172_v25, %v2972_v9  ;;  %v2070_v28 = vadd.f32 %v2069_v5, %v2068_v63  ;;  %v2071_v29 = vpop.f32.mrb[42].mxu0 }
 0x15b   : > { %v2072_v30 = vpop.f32.mrb[43].mxu0 }
 0x15c   : > { %1680 = vst [vmem:[%s2978_s5 + $0x10] sm:$0xff] %v1672_v26  ;;  %v1673_v35 = vmax.f32 %v1665_v27, 0.0  ;;  %v2180_v36 = vadd.f32 %v2179_v51, %v2070_v28  ;;  %v2073_v38 = vadd.f32 %v2072_v30, %v2071_v29 }
 0x15e   : > { %1681 = vst [vmem:[%s2978_s5 + $0x18] sm:$0xff] %v1673_v35  ;;  %v2181_v39 = vadd.f32 %v2180_v36, %v1632_v45  ;;  %v2186_v41 = vadd.f32 %v2185_v53, %v2073_v38 }
 0x160   : > { %v1666_v42 = vadd.f32 %v2181_v39, %v2972_v9  ;;  %v2187_v43 = vadd.f32 %v2186_v41, %v1635_v16  ;;  %v2074_v44 = vpop.f32.mrb[44].mxu0 }
 0x161   : > { %v2075_v47 = vpop.f32.mrb[45].mxu0 }
 0x162   : > { %v1674_v48 = vmax.f32 %v1666_v42, 0.0  ;;  %v1667_v49 = vadd.f32 %v2187_v43, %v2972_v9  ;;  %v2076_v50 = vadd.f32 %v2075_v47, %v2074_v44  ;;  %v2077_v52 = vpop.f32.mrb[46].mxu0 }
 0x163   : > { %v2078_v51 = vpop.f32.mrb[47].mxu0 }
 0x164   : > { %1682 = vst [vmem:[%s2978_s5 + $0x20] sm:$0xff] %v1674_v48  ;;  %v1675_v54 = vmax.f32 %v1667_v49, 0.0  ;;  %v2177_v53 = vadd.f32 %v2964_v59, %v2076_v50  ;;  %v2079_v55 = vadd.f32 %v2078_v51, %v2077_v52 }
 0x166   : > { %1683 = vst [vmem:[%s2978_s5 + $0x28] sm:$0xff] %v1675_v54  ;;  %v2178_v56 = vadd.f32 %v2177_v53, %v2162_v11  ;;  %v2183_v37 = vadd.f32 %v2966_v61, %v2079_v55 }
 0x168   : > { %v1668_v58 = vadd.f32 %v2178_v56, %v2972_v9  ;;  %v2184_v60 = vadd.f32 %v2183_v37, %v2163_v15 }
 0x16a   : > { %v1676_v33 = vmax.f32 %v1668_v58, 0.0  ;;  %v1669_v62 = vadd.f32 %v2184_v60, %v2972_v9 }
 0x16c   : > { %1684 = vst [vmem:[%s2978_s5 + $0x30] sm:$0xff] %v1676_v33  ;;  %v1677_v59 = vmax.f32 %v1669_v62, 0.0 }
 0x16e   : > { %1685 = vst [vmem:[%s2978_s5 + $0x38] sm:$0xff] %v1677_v59 }
 0x16f   : > { %2371 = shalt.err (!%p2368_p9)
}
 0x170   : > { %s2372_s11 = scalar_lea.hbm %s3000_s14, 1024  ;;  %s2376_s5 = scalar_lea.hbm %s3064_s4, 8192 }
 0x171   : > { %p2373_p10 = scmp.ne.s32.totalorder %s3000_s14, %s2372_s11  ;;  %p2377_p13 = scmp.lt.u32.totalorder %s3000_s14, %s3064_s4 }
 0x172   : > { %p2378_p0 = scmp.lt.u32.totalorder %s2376_s5, %s2372_s11  ;;  %p2380_p2 = scmp.lt.u32.totalorder %s2372_s11, %s3000_s14 }
 0x173   : > { %p2374_p11 = pnand %p2373_p10, %p2533_p3 }
 0x174   : > { %p2379_p1 = por %p2378_p0, %p2377_p13 }
 0x175   : > { %p2375_p12 = pneg %p2374_p11 }
 0x176   : > { %p2381_p4 = por %p2380_p2, %p2379_p1 }
 0x178   : > { %p2382_p5 = pnand %p2381_p4, %p2375_p12 }
 0x17a   : > { %2385 = shalt.err (!%p2382_p5)
}
 0x17b   : > { %s2455_s6 = smov 128   ;;  %s2456_s18 = smov 8  }
 0x17c   : > { %2207 = dma.vmem_to_hbm [thread:$0]  (%p2533_p3), %s3002_s19, 1024, %s3000_s14, %s3008_s25, %s2455_s6, %s2455_s6, %s2456_s18  }
 0x17d PF: > { %p2213_p6 = scmp.ge.s32.totalorder %s2452_s22, 2  ;;  %s1718_s26 = sand.u32 1, %s2424_s15  }
 0x17e   : > { %s1719_s9 = scalar_lea.sflag [#allocation4], %s1718_s26 }
 0x17f   : > { %p2210_p7 = pnand %p2213_p6, %p2542_p8 }
 0x181   : > { %2419 = dma.done.wait (!%p2210_p7), %s1719_s9, 1024  }
 0x182   : > { %2421 = vsyncadd (!%p2210_p7), %s1719_s9, 4294966272  ;;  %s17_s22 = sadd.s32 1, %s2452_s22   ;;  %s3075_s28 = sld [smem:[#allocation6_spill]] }
 0x183   : > { %p14_p9 = scmp.ge.s32.totalorder %s17_s22, 10   ;;  %s3076_s14 = sld [smem:[#allocation7_spill]] }
 0x184   : > { %s3077_s15 = smov %s2428_s16  ;;  %s3078_s16 = smov %s2432_s17 }
 0x185   : > { %s3079_s17 = smov %s2551_s7  ;;  %s3080_s18 = smov %s2444_s20 }
 0x186   : > { %s3081_s19 = smov %s2448_s21  ;;  %16 = sbr.rel (!%p14_p9) target bundleno = 5 (0x5), region = 74 }
 0x188   : > { %s3082_s20 = smov %s3075_s28 }
 0x189   : > { %s3083_s21 = smov %s3076_s14 }
 0x18d   :  { %1724 = vsyncpa [#allocation4], 1 }
 0x18e   :  { %1726 = vsyncpa [#allocation4 + $0x1], 1 }

</bundles_post_ra>
